<compile_context>
chip_gen: v5e
topology: v5e:2x2
jax: 0.10.0
libtpu: 0.0.40
codegen_flags: <defaults>
</compile_context>

<pallas_src>
import functools

import jax
import jax.numpy as jnp
import numpy as np
from jax.experimental import pallas as pl
from jax.experimental.pallas import tpu as pltpu

EPS = 1e-5  # PyTorch InstanceNorm2d default (affine=False, biased variance)


def _texture_encoder_block_kernel(x_ref, mask_ref, w1_ref, w2_ref, ws_ref, bs_ref,
                                  out_ref, *, H, W, Wpp):
    """Processes a (bt, Cin, L) batch tile -> (bt, Cout, L) on a zero-padded flat grid.

    Layout: every image lives on the flat (H+2)*(W+2) grid (lane-padded to L), real pixels at
    rows/cols [1..H]x[1..W].  A 3x3 tap at (dy, dx) is the lane roll by (dy-1)*Wpp + (dx-1),
    so all taps are produced in-register via the XLU -- zero VMEM scratch traffic.
    """
    L = x_ref.shape[-1]
    bt = x_ref.shape[0]
    inv_n = 1.0 / (H * W)
    mxu_dtype = w1_ref.dtype

    mask = mask_ref[...]            # (1, L) f32: 1.0 at the H*W real pixel positions
    w1 = w1_ref[...]                # (9, Cout, Cin)   conv1 taps (dy-major, dx)
    w2 = w2_ref[...]                # (9, Cout, Cout)  conv2 taps
    ws = ws_ref[...]                # (Cout, Cin)      1x1 skip projection
    bs = bs_ref[...]                # (Cout, 1) f32    skip bias

    def conv3x3(img, w_taps):
        # img: (C, L) f32.  One accumulating matmul per tap; shifted operands come from
        # pltpu.roll (XLU), so nothing is staged through VMEM.  b1/b2 are omitted: a
        # per-channel constant is cancelled exactly by the affine=False InstanceNorm below.
        acc = None
        for t in range(9):
            dy, dx = divmod(t, 3)
            off = (dy - 1) * Wpp + (dx - 1)
            tap = img if off == 0 else pltpu.roll(img, shift=(-off) % L, axis=1)
            y = jnp.dot(w_taps[t], tap.astype(mxu_dtype),
                        preferred_element_type=jnp.float32)
            acc = y if acc is None else acc + y
        return acc                   # (Cout, L) f32

    def inorm(v):
        # masked single-pass InstanceNorm statistics over the H*W valid positions
        vm = v * mask
        s1 = jnp.sum(vm, axis=1, keepdims=True) * inv_n
        s2 = jnp.sum(vm * v, axis=1, keepdims=True) * inv_n
        var = jnp.maximum(s2 - s1 * s1, 0.0)     # guard single-pass cancellation
        return (v - s1) * jax.lax.rsqrt(var + EPS)

    for i in range(bt):              # static (unrolled) loop over the batch tile
        x = x_ref[i]                 # (Cin, L) f32, zero halo already in place
        # skip path first (independent MXU work); its "center tap" is x itself -- no slice.
        skip = jnp.dot(ws, x.astype(mxu_dtype),
                       preferred_element_type=jnp.float32) + bs
        a1 = conv3x3(x, w1)
        # relu + mask in one pass; the mask also supplies conv2's zero padding.
        h1 = jnp.maximum(inorm(a1), 0.0) * mask
        a2 = conv3x3(h1, w2)
        h2 = inorm(a2)
        # positions outside the valid H*W window hold don't-care values (wrapper slices them).
        out_ref[i] = jnp.maximum(h2 + skip, 0.0).astype(out_ref.dtype)


def _vmem_limit_bytes():
    try:
        cap = int(pltpu.get_tpu_info().vmem_capacity_bytes)
    except Exception:
        cap = 64 * 1024 * 1024
    # leave >= 25% headroom for compiler scratch + double-buffered BlockSpec windows
    return max(16 * 1024 * 1024, min((cap * 3) // 4, 96 * 1024 * 1024))


def _pick_batch_tile(B, per_image_block_bytes, vmem_budget=8 * 1024 * 1024):
    """Fold several images per grid step, but keep >= 2 grid steps (both v7x TCs busy)."""
    if B <= 2:
        return 1
    cap = max(1, vmem_budget // max(per_image_block_bytes, 1))
    best = 1
    for cand in range(1, B // 2 + 1):
        if B % cand == 0 and cand <= cap:
            best = cand
    return best


def texture_encoder_block_forward(x_nchw, params, *, mxu_dtype=jnp.float32, batch_tile=None):
    """Pallas forward pass.  x_nchw: (B, Cin, H, W) -> (B, Cout, H, W) float32.

    mxu_dtype=jnp.bfloat16 runs the matmul operands in bf16 (v6e/v7x MXU fast path); all
    InstanceNorm statistics / elementwise math stay float32 (safe on v5e as well).
    """
    B, Cin, H, W = x_nchw.shape
    Cout = params["w1"].shape[-1]
    Hp, Wpp = H + 2, W + 2
    L = Hp * Wpp
    Lpad = ((L + 127) // 128) * 128          # lane-dense (unmasked) output stores

    x = x_nchw.astype(jnp.float32)
    # glue (no transposes): spatial zero-pad, row-flatten, lane-pad the tail with zeros
    x_pad = jnp.pad(x, ((0, 0), (0, 0), (1, 1), (1, 1)))
    x_flat = jnp.pad(x_pad.reshape(B, Cin, L), ((0, 0), (0, 0), (0, Lpad - L)))

    # validity mask of the padded flat grid (static constant)
    mask2d = np.zeros((Hp, Wpp), np.float32)
    mask2d[1:H + 1, 1:W + 1] = 1.0
    mask = jnp.asarray(np.pad(mask2d.reshape(-1), (0, Lpad - L)).reshape(1, Lpad))

    # per-tap weight blocks, Cout on the sublane axis.  b1/b2 are intentionally not passed:
    # they are cancelled exactly by the affine=False InstanceNorm.
    w1k = jnp.transpose(params["w1"], (0, 1, 3, 2)).reshape(9, Cout, Cin).astype(mxu_dtype)
    w2k = jnp.transpose(params["w2"], (0, 1, 3, 2)).reshape(9, Cout, Cout).astype(mxu_dtype)
    wsk = params["ws"].T.astype(mxu_dtype)                      # (Cout, Cin)
    bsk = params["bs"].reshape(Cout, 1).astype(jnp.float32)     # (Cout, 1)

    per_image_block_bytes = 4 * Lpad * (Cin + Cout) * 2         # double-buffered I/O windows
    bt = batch_tile or _pick_batch_tile(B, per_image_block_bytes)
    Bp = ((B + bt - 1) // bt) * bt
    if Bp != B:
        x_flat = jnp.pad(x_flat, ((0, Bp - B), (0, 0), (0, 0)))
    grid = (Bp // bt,)

    flops = 2 * B * H * W * Cout * (9 * Cin + 9 * Cout + Cin)
    bytes_accessed = int(
        4 * (Bp * (Cin + Cout) * Lpad + Lpad)
        + w1k.size * w1k.dtype.itemsize + w2k.size * w2k.dtype.itemsize
        + wsk.size * wsk.dtype.itemsize + 4 * Cout)

    grid_spec = pltpu.PrefetchScalarGridSpec(
        num_scalar_prefetch=0,
        grid=grid,
        in_specs=[
            pl.BlockSpec((bt, Cin, Lpad), lambda b: (b, 0, 0)),
            pl.BlockSpec((1, Lpad), lambda b: (0, 0)),
            pl.BlockSpec((9, Cout, Cin), lambda b: (0, 0, 0)),
            pl.BlockSpec((9, Cout, Cout), lambda b: (0, 0, 0)),
            pl.BlockSpec((Cout, Cin), lambda b: (0, 0)),
            pl.BlockSpec((Cout, 1), lambda b: (0, 0)),
        ],
        out_specs=pl.BlockSpec((bt, Cout, Lpad), lambda b: (b, 0, 0)),
    )

    out_flat = pl.pallas_call(
        functools.partial(_texture_encoder_block_kernel, H=H, W=W, Wpp=Wpp),
        out_shape=jax.ShapeDtypeStruct((Bp, Cout, Lpad), jnp.float32),
        grid_spec=grid_spec,
        compiler_params=pltpu.CompilerParams(
            dimension_semantics=("parallel",),
            vmem_limit_bytes=_vmem_limit_bytes(),
        ),
        cost_estimate=pl.CostEstimate(
            flops=flops, transcendentals=2 * B * Cout, bytes_accessed=bytes_accessed),
    )(x_flat, mask, w1k, w2k, wsk, bsk)

    # glue: drop padded batch / lane tail, un-flatten, slice the interior (no transpose)
    return out_flat[:B, :, :L].reshape(B, Cout, Hp, Wpp)[:, :, 1:H + 1, 1:W + 1]


def _reference_forward(x_nchw, params):
    """Pure-JAX reference (matches PyTorch semantics) for validation."""
    x = jnp.transpose(x_nchw, (0, 2, 3, 1)).astype(jnp.float32)

    def conv(inp, w, b):
        y = jax.lax.conv_general_dilated(
            inp, w, window_strides=(1, 1), padding="SAME",
            dimension_numbers=("NHWC", "HWIO", "NHWC"),
            precision=jax.lax.Precision.HIGHEST)
        return y + b

    def inorm(v):
        m = jnp.mean(v, axis=(1, 2), keepdims=True)
        var = jnp.mean((v - m) ** 2, axis=(1, 2), keepdims=True)
        return (v - m) * jax.lax.rsqrt(var + EPS)

    h = jax.nn.relu(inorm(conv(x, params["w1"], params["b1"])))
    h = inorm(conv(h, params["w2"], params["b2"])) 
    s = conv(x, params["ws"][None, None], params["bs"])
    y = jax.nn.relu(h + s)
    return jnp.transpose(y, (0, 3, 1, 2))


def init_params(key, in_channels, out_channels):
    k1, k2, k3, k4, k5, k6 = jax.random.split(key, 6)
    scale = 0.1
    return {
        "w1": scale * jax.random.normal(k1, (3, 3, in_channels, out_channels), jnp.float32),
        "b1": scale * jax.random.normal(k2, (1, out_channels), jnp.float32),
        "w2": scale * jax.random.normal(k3, (3, 3, out_channels, out_channels), jnp.float32),
        "b2": scale * jax.random.normal(k4, (1, out_channels), jnp.float32),
        "ws": scale * jax.random.normal(k5, (in_channels, out_channels), jnp.float32),
        "bs": scale * jax.random.normal(k6, (1, out_channels), jnp.float32),
    }


if __name__ == "__main__":
    B, Cin, Cout, H, W = 2, 4, 8, 16, 16

    key = jax.random.PRNGKey(0)
    kx, kp = jax.random.split(key)
    x = jax.random.normal(kx, (B, Cin, H, W), jnp.float32)
    params = init_params(kp, Cin, Cout)

    ref = jax.block_until_ready(_reference_forward(x, params))

    # exact path (f32 MXU operands) -- strict correctness check
    fwd = jax.jit(texture_encoder_block_forward)
    out = jax.block_until_ready(fwd(x, params))
    np.testing.assert_allclose(np.asarray(out), np.asarray(ref), atol=1e-4, rtol=1e-4)
    assert out.shape == (B, Cout, H, W)

    # bf16 MXU-operand fast path (v6e/v7x); norm/elementwise stay f32 -- loose sanity check
    fwd_bf16 = jax.jit(functools.partial(texture_encoder_block_forward,
                                         mxu_dtype=jnp.bfloat16))
    out_bf16 = jax.block_until_ready(fwd_bf16(x, params))
    np.testing.assert_allclose(np.asarray(out_bf16), np.asarray(ref), atol=1e-1, rtol=1e-1)

    print("KERNEL_OK")
</pallas_src>

<mosaic_0001>
module attributes {stable_mosaic.version = 11 : i64} {
  func.func @_texture_encoder_block_kernel(%arg0: i32, %arg1: memref<1x4x384xf32, #tpu.memory_space<vmem>>, %arg2: memref<1x384xf32, #tpu.memory_space<vmem>>, %arg3: memref<9x8x4xf32, #tpu.memory_space<vmem>>, %arg4: memref<9x8x8xf32, #tpu.memory_space<vmem>>, %arg5: memref<8x4xf32, #tpu.memory_space<vmem>>, %arg6: memref<8x1xf32, #tpu.memory_space<vmem>>, %arg7: memref<1x8x384xf32, #tpu.memory_space<vmem>>) attributes {dimension_semantics = [#tpu.dimension_semantics<parallel>], iteration_bounds = array<i64: 2>, scalar_prefetch = 0 : i64, scratch_operands = 0 : i64, tpu.core_type = #tpu.core_type<tc>, window_params = [{transform_indices = @transform_0, window_bounds = array<i64: 1, 4, 384>}, {pipeline_mode = #tpu.pipeline_mode<synchronous>, transform_indices = @transform_1, window_bounds = array<i64: 1, 384>}, {pipeline_mode = #tpu.pipeline_mode<synchronous>, transform_indices = @transform_2, window_bounds = array<i64: 9, 8, 4>}, {pipeline_mode = #tpu.pipeline_mode<synchronous>, transform_indices = @transform_3, window_bounds = array<i64: 9, 8, 8>}, {pipeline_mode = #tpu.pipeline_mode<synchronous>, transform_indices = @transform_4, window_bounds = array<i64: 8, 4>}, {pipeline_mode = #tpu.pipeline_mode<synchronous>, transform_indices = @transform_5, window_bounds = array<i64: 8, 1>}, {transform_indices = @transform_6, window_bounds = array<i64: 1, 8, 384>}]} {
    %c0 = arith.constant 0 : index
    %c0_0 = arith.constant 0 : index
    %0 = vector.load %arg2[%c0, %c0_0] : memref<1x384xf32, #tpu.memory_space<vmem>>, vector<1x384xf32>
    %c0_1 = arith.constant 0 : index
    %c0_2 = arith.constant 0 : index
    %c0_3 = arith.constant 0 : index
    %1 = vector.load %arg3[%c0_1, %c0_2, %c0_3] : memref<9x8x4xf32, #tpu.memory_space<vmem>>, vector<9x8x4xf32>
    %c0_4 = arith.constant 0 : index
    %c0_5 = arith.constant 0 : index
    %c0_6 = arith.constant 0 : index
    %2 = vector.load %arg4[%c0_4, %c0_5, %c0_6] : memref<9x8x8xf32, #tpu.memory_space<vmem>>, vector<9x8x8xf32>
    %c0_7 = arith.constant 0 : index
    %c0_8 = arith.constant 0 : index
    %3 = vector.load %arg5[%c0_7, %c0_8] : memref<8x4xf32, #tpu.memory_space<vmem>>, vector<8x4xf32>
    %c0_9 = arith.constant 0 : index
    %c0_10 = arith.constant 0 : index
    %4 = vector.load %arg6[%c0_9, %c0_10] : memref<8x1xf32, #tpu.memory_space<vmem>>, vector<8x1xf32>
    %c0_11 = arith.constant 0 : index
    %c0_12 = arith.constant 0 : index
    %c0_13 = arith.constant 0 : index
    %5 = vector.load %arg1[%c0_11, %c0_12, %c0_13] : memref<1x4x384xf32, #tpu.memory_space<vmem>>, vector<1x4x384xf32>
    %6 = vector.shape_cast %5 : vector<1x4x384xf32> to vector<4x384xf32>
    %cst = arith.constant dense<0.000000e+00> : vector<8x384xf32>
    %7 = tpu.matmul %3, %6, %cst {dimension_numbers = #tpu.dot_dimension_numbers<[1], [0], [0], [1], [0, 0, 1, 1], [], []>} : vector<8x4xf32>, vector<4x384xf32>, vector<8x384xf32> -> vector<8x384xf32>
    %8 = vector.broadcast %4 : vector<8x1xf32> to vector<8x384xf32>
    %9 = arith.addf %7, %8 : vector<8x384xf32>
    %c19_i32 = arith.constant 19 : i32
    %10 = tpu.dynamic_rotate %6 by %c19_i32 dim 1 : vector<4x384xf32>, i32 -> vector<4x384xf32>
    %11 = vector.extract_strided_slice %1 {offsets = [0, 0, 0], sizes = [1, 8, 4], strides = [1, 1, 1]} : vector<9x8x4xf32> to vector<1x8x4xf32>
    %12 = vector.shape_cast %11 : vector<1x8x4xf32> to vector<8x4xf32>
    %cst_14 = arith.constant dense<0.000000e+00> : vector<8x384xf32>
    %13 = tpu.matmul %12, %10, %cst_14 {dimension_numbers = #tpu.dot_dimension_numbers<[1], [0], [0], [1], [0, 0, 1, 1], [], []>} : vector<8x4xf32>, vector<4x384xf32>, vector<8x384xf32> -> vector<8x384xf32>
    %c18_i32 = arith.constant 18 : i32
    %14 = tpu.dynamic_rotate %6 by %c18_i32 dim 1 : vector<4x384xf32>, i32 -> vector<4x384xf32>
    %15 = vector.extract_strided_slice %1 {offsets = [1, 0, 0], sizes = [1, 8, 4], strides = [1, 1, 1]} : vector<9x8x4xf32> to vector<1x8x4xf32>
    %16 = vector.shape_cast %15 : vector<1x8x4xf32> to vector<8x4xf32>
    %cst_15 = arith.constant dense<0.000000e+00> : vector<8x384xf32>
    %17 = tpu.matmul %16, %14, %cst_15 {dimension_numbers = #tpu.dot_dimension_numbers<[1], [0], [0], [1], [0, 0, 1, 1], [], []>} : vector<8x4xf32>, vector<4x384xf32>, vector<8x384xf32> -> vector<8x384xf32>
    %18 = arith.addf %13, %17 : vector<8x384xf32>
    %c17_i32 = arith.constant 17 : i32
    %19 = tpu.dynamic_rotate %6 by %c17_i32 dim 1 : vector<4x384xf32>, i32 -> vector<4x384xf32>
    %20 = vector.extract_strided_slice %1 {offsets = [2, 0, 0], sizes = [1, 8, 4], strides = [1, 1, 1]} : vector<9x8x4xf32> to vector<1x8x4xf32>
    %21 = vector.shape_cast %20 : vector<1x8x4xf32> to vector<8x4xf32>
    %cst_16 = arith.constant dense<0.000000e+00> : vector<8x384xf32>
    %22 = tpu.matmul %21, %19, %cst_16 {dimension_numbers = #tpu.dot_dimension_numbers<[1], [0], [0], [1], [0, 0, 1, 1], [], []>} : vector<8x4xf32>, vector<4x384xf32>, vector<8x384xf32> -> vector<8x384xf32>
    %23 = arith.addf %18, %22 : vector<8x384xf32>
    %c1_i32 = arith.constant 1 : i32
    %24 = tpu.dynamic_rotate %6 by %c1_i32 dim 1 : vector<4x384xf32>, i32 -> vector<4x384xf32>
    %25 = vector.extract_strided_slice %1 {offsets = [3, 0, 0], sizes = [1, 8, 4], strides = [1, 1, 1]} : vector<9x8x4xf32> to vector<1x8x4xf32>
    %26 = vector.shape_cast %25 : vector<1x8x4xf32> to vector<8x4xf32>
    %cst_17 = arith.constant dense<0.000000e+00> : vector<8x384xf32>
    %27 = tpu.matmul %26, %24, %cst_17 {dimension_numbers = #tpu.dot_dimension_numbers<[1], [0], [0], [1], [0, 0, 1, 1], [], []>} : vector<8x4xf32>, vector<4x384xf32>, vector<8x384xf32> -> vector<8x384xf32>
    %28 = arith.addf %23, %27 : vector<8x384xf32>
    %29 = vector.extract_strided_slice %1 {offsets = [4, 0, 0], sizes = [1, 8, 4], strides = [1, 1, 1]} : vector<9x8x4xf32> to vector<1x8x4xf32>
    %30 = vector.shape_cast %29 : vector<1x8x4xf32> to vector<8x4xf32>
    %cst_18 = arith.constant dense<0.000000e+00> : vector<8x384xf32>
    %31 = tpu.matmul %30, %6, %cst_18 {dimension_numbers = #tpu.dot_dimension_numbers<[1], [0], [0], [1], [0, 0, 1, 1], [], []>} : vector<8x4xf32>, vector<4x384xf32>, vector<8x384xf32> -> vector<8x384xf32>
    %32 = arith.addf %28, %31 : vector<8x384xf32>
    %c383_i32 = arith.constant 383 : i32
    %33 = tpu.dynamic_rotate %6 by %c383_i32 dim 1 : vector<4x384xf32>, i32 -> vector<4x384xf32>
    %34 = vector.extract_strided_slice %1 {offsets = [5, 0, 0], sizes = [1, 8, 4], strides = [1, 1, 1]} : vector<9x8x4xf32> to vector<1x8x4xf32>
    %35 = vector.shape_cast %34 : vector<1x8x4xf32> to vector<8x4xf32>
    %cst_19 = arith.constant dense<0.000000e+00> : vector<8x384xf32>
    %36 = tpu.matmul %35, %33, %cst_19 {dimension_numbers = #tpu.dot_dimension_numbers<[1], [0], [0], [1], [0, 0, 1, 1], [], []>} : vector<8x4xf32>, vector<4x384xf32>, vector<8x384xf32> -> vector<8x384xf32>
    %37 = arith.addf %32, %36 : vector<8x384xf32>
    %c367_i32 = arith.constant 367 : i32
    %38 = tpu.dynamic_rotate %6 by %c367_i32 dim 1 : vector<4x384xf32>, i32 -> vector<4x384xf32>
    %39 = vector.extract_strided_slice %1 {offsets = [6, 0, 0], sizes = [1, 8, 4], strides = [1, 1, 1]} : vector<9x8x4xf32> to vector<1x8x4xf32>
    %40 = vector.shape_cast %39 : vector<1x8x4xf32> to vector<8x4xf32>
    %cst_20 = arith.constant dense<0.000000e+00> : vector<8x384xf32>
    %41 = tpu.matmul %40, %38, %cst_20 {dimension_numbers = #tpu.dot_dimension_numbers<[1], [0], [0], [1], [0, 0, 1, 1], [], []>} : vector<8x4xf32>, vector<4x384xf32>, vector<8x384xf32> -> vector<8x384xf32>
    %42 = arith.addf %37, %41 : vector<8x384xf32>
    %c366_i32 = arith.constant 366 : i32
    %43 = tpu.dynamic_rotate %6 by %c366_i32 dim 1 : vector<4x384xf32>, i32 -> vector<4x384xf32>
    %44 = vector.extract_strided_slice %1 {offsets = [7, 0, 0], sizes = [1, 8, 4], strides = [1, 1, 1]} : vector<9x8x4xf32> to vector<1x8x4xf32>
    %45 = vector.shape_cast %44 : vector<1x8x4xf32> to vector<8x4xf32>
    %cst_21 = arith.constant dense<0.000000e+00> : vector<8x384xf32>
    %46 = tpu.matmul %45, %43, %cst_21 {dimension_numbers = #tpu.dot_dimension_numbers<[1], [0], [0], [1], [0, 0, 1, 1], [], []>} : vector<8x4xf32>, vector<4x384xf32>, vector<8x384xf32> -> vector<8x384xf32>
    %47 = arith.addf %42, %46 : vector<8x384xf32>
    %c365_i32 = arith.constant 365 : i32
    %48 = tpu.dynamic_rotate %6 by %c365_i32 dim 1 : vector<4x384xf32>, i32 -> vector<4x384xf32>
    %49 = vector.extract_strided_slice %1 {offsets = [8, 0, 0], sizes = [1, 8, 4], strides = [1, 1, 1]} : vector<9x8x4xf32> to vector<1x8x4xf32>
    %50 = vector.shape_cast %49 : vector<1x8x4xf32> to vector<8x4xf32>
    %cst_22 = arith.constant dense<0.000000e+00> : vector<8x384xf32>
    %51 = tpu.matmul %50, %48, %cst_22 {dimension_numbers = #tpu.dot_dimension_numbers<[1], [0], [0], [1], [0, 0, 1, 1], [], []>} : vector<8x4xf32>, vector<4x384xf32>, vector<8x384xf32> -> vector<8x384xf32>
    %52 = arith.addf %47, %51 : vector<8x384xf32>
    %53 = vector.broadcast %0 : vector<1x384xf32> to vector<8x384xf32>
    %54 = arith.mulf %52, %53 : vector<8x384xf32>
    %cst_23 = arith.constant dense<0.000000e+00> : vector<8xf32>
    %55 = vector.multi_reduction <add>, %54, %cst_23 [1] : vector<8x384xf32> to vector<8xf32>
    %56 = vector.shape_cast %55 : vector<8xf32> to vector<8x1xf32>
    %cst_24 = arith.constant 3.906250e-03 : f32
    %57 = vector.broadcast %cst_24 : f32 to vector<8x1xf32>
    %58 = arith.mulf %56, %57 : vector<8x1xf32>
    %59 = arith.mulf %54, %52 : vector<8x384xf32>
    %cst_25 = arith.constant dense<0.000000e+00> : vector<8xf32>
    %60 = vector.multi_reduction <add>, %59, %cst_25 [1] : vector<8x384xf32> to vector<8xf32>
    %61 = vector.shape_cast %60 : vector<8xf32> to vector<8x1xf32>
    %cst_26 = arith.constant 3.906250e-03 : f32
    %62 = vector.broadcast %cst_26 : f32 to vector<8x1xf32>
    %63 = arith.mulf %61, %62 : vector<8x1xf32>
    %64 = arith.mulf %58, %58 : vector<8x1xf32>
    %65 = arith.subf %63, %64 : vector<8x1xf32>
    %cst_27 = arith.constant 0.000000e+00 : f32
    %66 = vector.broadcast %cst_27 : f32 to vector<8x1xf32>
    %67 = arith.maximumf %65, %66 : vector<8x1xf32>
    %68 = vector.broadcast %58 : vector<8x1xf32> to vector<8x384xf32>
    %69 = arith.subf %52, %68 : vector<8x384xf32>
    %cst_28 = arith.constant 9.99999974E-6 : f32
    %70 = vector.broadcast %cst_28 : f32 to vector<8x1xf32>
    %71 = arith.addf %67, %70 : vector<8x1xf32>
    %72 = math.rsqrt %71 : vector<8x1xf32>
    %73 = vector.broadcast %72 : vector<8x1xf32> to vector<8x384xf32>
    %74 = arith.mulf %69, %73 : vector<8x384xf32>
    %cst_29 = arith.constant 0.000000e+00 : f32
    %75 = vector.broadcast %cst_29 : f32 to vector<8x384xf32>
    %76 = arith.maximumf %74, %75 : vector<8x384xf32>
    %77 = vector.broadcast %0 : vector<1x384xf32> to vector<8x384xf32>
    %78 = arith.mulf %76, %77 : vector<8x384xf32>
    %c19_i32_30 = arith.constant 19 : i32
    %79 = tpu.dynamic_rotate %78 by %c19_i32_30 dim 1 : vector<8x384xf32>, i32 -> vector<8x384xf32>
    %80 = vector.extract_strided_slice %2 {offsets = [0, 0, 0], sizes = [1, 8, 8], strides = [1, 1, 1]} : vector<9x8x8xf32> to vector<1x8x8xf32>
    %81 = vector.shape_cast %80 : vector<1x8x8xf32> to vector<8x8xf32>
    %cst_31 = arith.constant dense<0.000000e+00> : vector<8x384xf32>
    %82 = tpu.matmul %81, %79, %cst_31 {dimension_numbers = #tpu.dot_dimension_numbers<[1], [0], [0], [1], [0, 0, 1, 1], [], []>} : vector<8x8xf32>, vector<8x384xf32>, vector<8x384xf32> -> vector<8x384xf32>
    %c18_i32_32 = arith.constant 18 : i32
    %83 = tpu.dynamic_rotate %78 by %c18_i32_32 dim 1 : vector<8x384xf32>, i32 -> vector<8x384xf32>
    %84 = vector.extract_strided_slice %2 {offsets = [1, 0, 0], sizes = [1, 8, 8], strides = [1, 1, 1]} : vector<9x8x8xf32> to vector<1x8x8xf32>
    %85 = vector.shape_cast %84 : vector<1x8x8xf32> to vector<8x8xf32>
    %cst_33 = arith.constant dense<0.000000e+00> : vector<8x384xf32>
    %86 = tpu.matmul %85, %83, %cst_33 {dimension_numbers = #tpu.dot_dimension_numbers<[1], [0], [0], [1], [0, 0, 1, 1], [], []>} : vector<8x8xf32>, vector<8x384xf32>, vector<8x384xf32> -> vector<8x384xf32>
    %87 = arith.addf %82, %86 : vector<8x384xf32>
    %c17_i32_34 = arith.constant 17 : i32
    %88 = tpu.dynamic_rotate %78 by %c17_i32_34 dim 1 : vector<8x384xf32>, i32 -> vector<8x384xf32>
    %89 = vector.extract_strided_slice %2 {offsets = [2, 0, 0], sizes = [1, 8, 8], strides = [1, 1, 1]} : vector<9x8x8xf32> to vector<1x8x8xf32>
    %90 = vector.shape_cast %89 : vector<1x8x8xf32> to vector<8x8xf32>
    %cst_35 = arith.constant dense<0.000000e+00> : vector<8x384xf32>
    %91 = tpu.matmul %90, %88, %cst_35 {dimension_numbers = #tpu.dot_dimension_numbers<[1], [0], [0], [1], [0, 0, 1, 1], [], []>} : vector<8x8xf32>, vector<8x384xf32>, vector<8x384xf32> -> vector<8x384xf32>
    %92 = arith.addf %87, %91 : vector<8x384xf32>
    %c1_i32_36 = arith.constant 1 : i32
    %93 = tpu.dynamic_rotate %78 by %c1_i32_36 dim 1 : vector<8x384xf32>, i32 -> vector<8x384xf32>
    %94 = vector.extract_strided_slice %2 {offsets = [3, 0, 0], sizes = [1, 8, 8], strides = [1, 1, 1]} : vector<9x8x8xf32> to vector<1x8x8xf32>
    %95 = vector.shape_cast %94 : vector<1x8x8xf32> to vector<8x8xf32>
    %cst_37 = arith.constant dense<0.000000e+00> : vector<8x384xf32>
    %96 = tpu.matmul %95, %93, %cst_37 {dimension_numbers = #tpu.dot_dimension_numbers<[1], [0], [0], [1], [0, 0, 1, 1], [], []>} : vector<8x8xf32>, vector<8x384xf32>, vector<8x384xf32> -> vector<8x384xf32>
    %97 = arith.addf %92, %96 : vector<8x384xf32>
    %98 = vector.extract_strided_slice %2 {offsets = [4, 0, 0], sizes = [1, 8, 8], strides = [1, 1, 1]} : vector<9x8x8xf32> to vector<1x8x8xf32>
    %99 = vector.shape_cast %98 : vector<1x8x8xf32> to vector<8x8xf32>
    %cst_38 = arith.constant dense<0.000000e+00> : vector<8x384xf32>
    %100 = tpu.matmul %99, %78, %cst_38 {dimension_numbers = #tpu.dot_dimension_numbers<[1], [0], [0], [1], [0, 0, 1, 1], [], []>} : vector<8x8xf32>, vector<8x384xf32>, vector<8x384xf32> -> vector<8x384xf32>
    %101 = arith.addf %97, %100 : vector<8x384xf32>
    %c383_i32_39 = arith.constant 383 : i32
    %102 = tpu.dynamic_rotate %78 by %c383_i32_39 dim 1 : vector<8x384xf32>, i32 -> vector<8x384xf32>
    %103 = vector.extract_strided_slice %2 {offsets = [5, 0, 0], sizes = [1, 8, 8], strides = [1, 1, 1]} : vector<9x8x8xf32> to vector<1x8x8xf32>
    %104 = vector.shape_cast %103 : vector<1x8x8xf32> to vector<8x8xf32>
    %cst_40 = arith.constant dense<0.000000e+00> : vector<8x384xf32>
    %105 = tpu.matmul %104, %102, %cst_40 {dimension_numbers = #tpu.dot_dimension_numbers<[1], [0], [0], [1], [0, 0, 1, 1], [], []>} : vector<8x8xf32>, vector<8x384xf32>, vector<8x384xf32> -> vector<8x384xf32>
    %106 = arith.addf %101, %105 : vector<8x384xf32>
    %c367_i32_41 = arith.constant 367 : i32
    %107 = tpu.dynamic_rotate %78 by %c367_i32_41 dim 1 : vector<8x384xf32>, i32 -> vector<8x384xf32>
    %108 = vector.extract_strided_slice %2 {offsets = [6, 0, 0], sizes = [1, 8, 8], strides = [1, 1, 1]} : vector<9x8x8xf32> to vector<1x8x8xf32>
    %109 = vector.shape_cast %108 : vector<1x8x8xf32> to vector<8x8xf32>
    %cst_42 = arith.constant dense<0.000000e+00> : vector<8x384xf32>
    %110 = tpu.matmul %109, %107, %cst_42 {dimension_numbers = #tpu.dot_dimension_numbers<[1], [0], [0], [1], [0, 0, 1, 1], [], []>} : vector<8x8xf32>, vector<8x384xf32>, vector<8x384xf32> -> vector<8x384xf32>
    %111 = arith.addf %106, %110 : vector<8x384xf32>
    %c366_i32_43 = arith.constant 366 : i32
    %112 = tpu.dynamic_rotate %78 by %c366_i32_43 dim 1 : vector<8x384xf32>, i32 -> vector<8x384xf32>
    %113 = vector.extract_strided_slice %2 {offsets = [7, 0, 0], sizes = [1, 8, 8], strides = [1, 1, 1]} : vector<9x8x8xf32> to vector<1x8x8xf32>
    %114 = vector.shape_cast %113 : vector<1x8x8xf32> to vector<8x8xf32>
    %cst_44 = arith.constant dense<0.000000e+00> : vector<8x384xf32>
    %115 = tpu.matmul %114, %112, %cst_44 {dimension_numbers = #tpu.dot_dimension_numbers<[1], [0], [0], [1], [0, 0, 1, 1], [], []>} : vector<8x8xf32>, vector<8x384xf32>, vector<8x384xf32> -> vector<8x384xf32>
    %116 = arith.addf %111, %115 : vector<8x384xf32>
    %c365_i32_45 = arith.constant 365 : i32
    %117 = tpu.dynamic_rotate %78 by %c365_i32_45 dim 1 : vector<8x384xf32>, i32 -> vector<8x384xf32>
    %118 = vector.extract_strided_slice %2 {offsets = [8, 0, 0], sizes = [1, 8, 8], strides = [1, 1, 1]} : vector<9x8x8xf32> to vector<1x8x8xf32>
    %119 = vector.shape_cast %118 : vector<1x8x8xf32> to vector<8x8xf32>
    %cst_46 = arith.constant dense<0.000000e+00> : vector<8x384xf32>
    %120 = tpu.matmul %119, %117, %cst_46 {dimension_numbers = #tpu.dot_dimension_numbers<[1], [0], [0], [1], [0, 0, 1, 1], [], []>} : vector<8x8xf32>, vector<8x384xf32>, vector<8x384xf32> -> vector<8x384xf32>
    %121 = arith.addf %116, %120 : vector<8x384xf32>
    %122 = vector.broadcast %0 : vector<1x384xf32> to vector<8x384xf32>
    %123 = arith.mulf %121, %122 : vector<8x384xf32>
    %cst_47 = arith.constant dense<0.000000e+00> : vector<8xf32>
    %124 = vector.multi_reduction <add>, %123, %cst_47 [1] : vector<8x384xf32> to vector<8xf32>
    %125 = vector.shape_cast %124 : vector<8xf32> to vector<8x1xf32>
    %cst_48 = arith.constant 3.906250e-03 : f32
    %126 = vector.broadcast %cst_48 : f32 to vector<8x1xf32>
    %127 = arith.mulf %125, %126 : vector<8x1xf32>
    %128 = arith.mulf %123, %121 : vector<8x384xf32>
    %cst_49 = arith.constant dense<0.000000e+00> : vector<8xf32>
    %129 = vector.multi_reduction <add>, %128, %cst_49 [1] : vector<8x384xf32> to vector<8xf32>
    %130 = vector.shape_cast %129 : vector<8xf32> to vector<8x1xf32>
    %cst_50 = arith.constant 3.906250e-03 : f32
    %131 = vector.broadcast %cst_50 : f32 to vector<8x1xf32>
    %132 = arith.mulf %130, %131 : vector<8x1xf32>
    %133 = arith.mulf %127, %127 : vector<8x1xf32>
    %134 = arith.subf %132, %133 : vector<8x1xf32>
    %cst_51 = arith.constant 0.000000e+00 : f32
    %135 = vector.broadcast %cst_51 : f32 to vector<8x1xf32>
    %136 = arith.maximumf %134, %135 : vector<8x1xf32>
    %137 = vector.broadcast %127 : vector<8x1xf32> to vector<8x384xf32>
    %138 = arith.subf %121, %137 : vector<8x384xf32>
    %cst_52 = arith.constant 9.99999974E-6 : f32
    %139 = vector.broadcast %cst_52 : f32 to vector<8x1xf32>
    %140 = arith.addf %136, %139 : vector<8x1xf32>
    %141 = math.rsqrt %140 : vector<8x1xf32>
    %142 = vector.broadcast %141 : vector<8x1xf32> to vector<8x384xf32>
    %143 = arith.mulf %138, %142 : vector<8x384xf32>
    %144 = arith.addf %143, %9 : vector<8x384xf32>
    %cst_53 = arith.constant 0.000000e+00 : f32
    %145 = vector.broadcast %cst_53 : f32 to vector<8x384xf32>
    %146 = arith.maximumf %144, %145 : vector<8x384xf32>
    %c0_54 = arith.constant 0 : index
    %c0_55 = arith.constant 0 : index
    %c0_56 = arith.constant 0 : index
    %147 = vector.load %arg7[%c0_54, %c0_55, %c0_56] : memref<1x8x384xf32, #tpu.memory_space<vmem>>, vector<1x8x384xf32>
    %148 = vector.shape_cast %147 : vector<1x8x384xf32> to vector<8x384xf32>
    %149 = vector.shape_cast %146 : vector<8x384xf32> to vector<1x8x384xf32>
    tpu.vector_store %arg7[%c0_54, %c0_55, %c0_56], %149 {strides = array<i32>} : memref<1x8x384xf32, #tpu.memory_space<vmem>>, vector<1x8x384xf32>,
    return
  }
  func.func @transform_0(%arg0: i32) -> (i32, i32, i32) {
    %c0_i32 = arith.constant 0 : i32
    %c0_i32_0 = arith.constant 0 : i32
    %c0_i32_1 = arith.constant 0 : i32
    return %arg0, %c0_i32, %c0_i32_0 : i32, i32, i32
  }
  func.func @transform_1(%arg0: i32) -> (i32, i32) {
    %c0_i32 = arith.constant 0 : i32
    %c0_i32_0 = arith.constant 0 : i32
    %c0_i32_1 = arith.constant 0 : i32
    return %c0_i32, %c0_i32_0 : i32, i32
  }
  func.func @transform_2(%arg0: i32) -> (i32, i32, i32) {
    %c0_i32 = arith.constant 0 : i32
    %c0_i32_0 = arith.constant 0 : i32
    %c0_i32_1 = arith.constant 0 : i32
    %c0_i32_2 = arith.constant 0 : i32
    return %c0_i32, %c0_i32_0, %c0_i32_1 : i32, i32, i32
  }
  func.func @transform_3(%arg0: i32) -> (i32, i32, i32) {
    %c0_i32 = arith.constant 0 : i32
    %c0_i32_0 = arith.constant 0 : i32
    %c0_i32_1 = arith.constant 0 : i32
    %c0_i32_2 = arith.constant 0 : i32
    return %c0_i32, %c0_i32_0, %c0_i32_1 : i32, i32, i32
  }
  func.func @transform_4(%arg0: i32) -> (i32, i32) {
    %c0_i32 = arith.constant 0 : i32
    %c0_i32_0 = arith.constant 0 : i32
    %c0_i32_1 = arith.constant 0 : i32
    return %c0_i32, %c0_i32_0 : i32, i32
  }
  func.func @transform_5(%arg0: i32) -> (i32, i32) {
    %c0_i32 = arith.constant 0 : i32
    %c0_i32_0 = arith.constant 0 : i32
    %c0_i32_1 = arith.constant 0 : i32
    return %c0_i32, %c0_i32_0 : i32, i32
  }
  func.func @transform_6(%arg0: i32) -> (i32, i32, i32) {
    %c0_i32 = arith.constant 0 : i32
    %c0_i32_0 = arith.constant 0 : i32
    %c0_i32_1 = arith.constant 0 : i32
    return %arg0, %c0_i32, %c0_i32_0 : i32, i32, i32
  }
}

</mosaic_0001>

<bundles_post_ra>
// kernel: texture_encoder_block_forward.1
= control target key start
LH: loop header
LB: loop body
LE: loop exit
PB: predicated region body
PF: predicated region fallthrough
CT: control target
= control target key end

     0   :  { %s2208_s21 = smov 0   ;;  %s2607_s0 = inlined_call_operand.vmem [shape: f32[2,4,384], index: 0, kind: input, shape index: {}]   ;;  %s2608_s1 = inlined_call_operand.vmem [shape: f32[1,384], index: 1, kind: input, shape index: {}]   ;;  %s2609_s2 = inlined_call_operand.vmem [shape: f32[9,8,4], index: 2, kind: input, shape index: {}]   ;;  %s2610_s3 = inlined_call_operand.vmem [shape: f32[9,8,8], index: 3, kind: input, shape index: {}]   ;;  %s2611_s4 = inlined_call_operand.vmem [shape: f32[8,4], index: 4, kind: input, shape index: {}]   ;;  %s2612_s5 = inlined_call_operand.vmem [shape: f32[8,1], index: 5, kind: input, shape index: {}]   ;;  %s2613_s6 = inlined_call_operand.vmem [shape: f32[2,8,384], index: 6, kind: output, shape index: {}]  }
   0x1 LB: > { %s1995_s22 = sadd.s32 4294967295, %s2162_s21   ;;  %p1999_p0 = scmp.ge.s32.totalorder %s2162_s21, 1  ;;  %s2162_s21 = sphi %s2208_s21, %s16_s21  }
   0x2   : > { %p212_p1 = scmp.lt.s32.totalorder %s2162_s21, 3 }
   0x4   : > { %p213_p2 = pnand %p1999_p0, %p212_p1 }
   0x5   : > { %p242_p3 = scmp.lt.s32.totalorder (!%p213_p2), %s1995_s22, 1  ;;  %s2164_s27 = smov (!%p213_p2), 19  }
   0x6   : > { %216 = sbr.rel (%p213_p2) target bundleno = 967 (0x3c7), region = 44  ;;  %s2165_s28 = smov (!%p213_p2), 18  }
   0x7   : > { %s2166_s29 = smov (!%p213_p2), 17   ;;  %s2167_s30 = smov (!%p213_p2), 1  }
   0x8   : > { %s2168_s7 = smov (!%p213_p2), 127   ;;  %s2169_s8 = smov (!%p213_p2), 111  }
   0x9   : > { %s2170_s9 = smov (!%p213_p2), 110   ;;  %s2171_s10 = smov (!%p213_p2), 109  }
   0xb   : > { %s2615_s22 = smov (!%p242_p3, %s1995_s22), 1  ;;  %vm292_vm0 = vcmask 1043456   ;;  %v271_v32 = vld [vmem:[%s2611_s4] sm:$0xff]  ;;  %vm288_vm1 = vcmask 31744   ;;  %v374_v34 = vlaneseq  ;;  %v254_v44 = vld [vmem:[%s2609_s2 + $0x8] sm:$0xff]  ;;  %v255_v54 = vld [vmem:[%s2609_s2 + $0x10] sm:$0xff] }
   0xc   : > { %s2091_s23 = smul.u32 12, %s2615_s22  ;;  %v253_v38 = vld [vmem:[%s2609_s2] sm:$0xff]  ;;  %v256_v60 = vld [vmem:[%s2609_s2 + $0x18] sm:$0xff]  ;;  %vm1252_vm13 = vcmask 64512  }
   0xd   : > { %v2294_v35 = vand.u32 127, %v374_v34  ;;  %s2092_s17 = smul.u32 24, %s2615_s22 }
   0xe   : > { %s246_s26 = scalar_lea.vmem %s2607_s0, %s2091_s23 }
   0xf   : > { %v2222_v0 = vld [vmem:[%s246_s26] sm:$0xff]  ;;  %v2224_v1 = vld [vmem:[%s246_s26 + $0x8] sm:$0xf]  ;;  %vm376_vm2 = vcmp.lt.s32.totalorder %v2294_v35, 19  ;;  %vm395_vm3 = vcmp.lt.s32.totalorder %v2294_v35, 18  ;;  %vm558_vm4 = vcmp.lt.s32.totalorder %v2294_v35, 17  ;;  %s251_s20 = scalar_lea.vmem %s2613_s6, %s2092_s17 }
  0x10   : > { %282 = vst [vmem:[#allocation1] ss:$2 sm:$0xff] %v2222_v0  ;;  %vm652_vm5 = vcmp.lt.s32.totalorder %v2294_v35, 1  ;;  %vm824_vm6 = vcmp.lt.s32.totalorder %v2294_v35, 127  ;;  %vm918_vm7 = vcmp.lt.s32.totalorder %v2294_v35, 111  ;;  %vm1012_vm8 = vcmp.lt.s32.totalorder %v2294_v35, 110 }
  0x11   : > { %284 = vst [vmem:[#allocation1 + $0x10] ss:$2 sm:$0xff] %v2224_v1  ;;  %vm1106_vm9 = vcmp.lt.s32.totalorder %v2294_v35, 109 }
  0x17   : > { %v2228_v2 = vld.sshfl [vmem:[#allocation1] sm:$0xff pattern:$0x75316420]  ;;  %v2230_v3 = vld.sshfl [vmem:[#allocation1 + $0x8] sm:$0xff pattern:$0x75316420] }
  0x18   : > { %359 = vst [vmem:[#allocation1] ss:$2 sm:$0xff] %v2222_v0  ;;  %v2233_v4 = vld.sshfl [vmem:[#allocation1 + $0x10] sm:$0xff pattern:$0x75316420]  ;;  %2002 = vmatpush.msk.msra.mxu0 %vm292_vm0, %v2228_v2  ;;  %2004 = vmatpush.msk.msra.mxu1 %vm292_vm0, %v2230_v3  ;;  %v257_v2 = vld [vmem:[%s2609_s2 + $0x20] sm:$0xff] }
  0x19   : > { %361 = vst [vmem:[#allocation1 + $0x10] ss:$2 sm:$0xff] %v2224_v1  ;;  %2006 = vmatpush.msk.msra.mxu2 %vm292_vm0, %v2233_v4  ;;  %2003 = vmatmul.msk.f32.vlgmr.msra.gmra.mxu0 %vm288_vm1, %v271_v32 }
  0x1a   : > { %2005 = vmatmul.msk.f32.vlgmr.msra.gmra.mxu1 %vm288_vm1, %v271_v32  ;;  %2007 = vmatmul.msk.f32.vlgmr.msra.gmra.mxu2 %vm288_vm1, %v271_v32 }
  0x1f   : > { %v362_v5 = vld.sshfl [vmem:[#allocation1] sm:$0xff pattern:$0x75316420]  ;;  %v363_v6 = vld.sshfl [vmem:[#allocation1 + $0x8] sm:$0xff pattern:$0x75316420] }
  0x20   : > { %368 = vrot.lane.b32.xlu1 %v362_v5, %s2164_s27  ;;  %380 = vst [vmem:[#allocation1] ss:$2 sm:$0xff] %v2222_v0  ;;  %v364_v7 = vld.sshfl [vmem:[#allocation1 + $0x10] sm:$0xff pattern:$0x75316420]  ;;  %370 = vrot.lane.b32.xlu2 %v363_v6, %s2164_s27  ;;  %v258_v6 = vld [vmem:[%s2609_s2 + $0x28] sm:$0xff] }
  0x21   : > { %382 = vst [vmem:[#allocation1 + $0x10] ss:$2 sm:$0xff] %v2224_v1 }
  0x27   : > { %v384_v8 = vld.sshfl [vmem:[#allocation1 + $0x8] sm:$0xff pattern:$0x75316420]  ;;  %v383_v9 = vld.sshfl [vmem:[#allocation1] sm:$0xff pattern:$0x75316420] }
  0x28   : > { %391 = vrot.lane.b32.xlu1 %v384_v8, %s2165_s28  ;;  %389 = vrot.lane.b32.xlu0 %v383_v9, %s2165_s28  ;;  %543 = vst [vmem:[#allocation1] ss:$2 sm:$0xff] %v2222_v0  ;;  %v385_v10 = vld.sshfl [vmem:[#allocation1 + $0x10] sm:$0xff pattern:$0x75316420] }
  0x29   : > { %545 = vst [vmem:[#allocation1 + $0x10] ss:$2 sm:$0xff] %v2224_v1  ;;  %372 = vrot.lane.b32.xlu2 %v364_v7, %s2164_s27 }
  0x2f   : > { %v547_v11 = vld.sshfl [vmem:[#allocation1 + $0x8] sm:$0xff pattern:$0x75316420]  ;;  %v546_v12 = vld.sshfl [vmem:[#allocation1] sm:$0xff pattern:$0x75316420] }
  0x30   : > { %v548_v13 = vld.sshfl [vmem:[#allocation1 + $0x10] sm:$0xff pattern:$0x75316420]  ;;  %393 = vrot.lane.b32.xlu0 %v385_v10, %s2165_s28  ;;  %554 = vrot.lane.b32.xlu1 %v547_v11, %s2166_s29  ;;  %637 = vst [vmem:[#allocation1] ss:$2 sm:$0xff] %v2222_v0 }
  0x31   : > { %639 = vst [vmem:[#allocation1 + $0x10] ss:$2 sm:$0xff] %v2224_v1  ;;  %556 = vrot.lane.b32.xlu2 %v548_v13, %s2166_s29  ;;  %v259_v13 = vld [vmem:[%s2609_s2 + $0x30] sm:$0xff] }
  0x37   : > { %v641_v14 = vld.sshfl [vmem:[#allocation1 + $0x8] sm:$0xff pattern:$0x75316420]  ;;  %v640_v15 = vld.sshfl [vmem:[#allocation1] sm:$0xff pattern:$0x75316420] }
  0x38   : > { %552 = vrot.lane.b32.xlu0 %v546_v12, %s2166_s29  ;;  %v642_v16 = vld.sshfl [vmem:[#allocation1 + $0x10] sm:$0xff pattern:$0x75316420]  ;;  %731 = vst [vmem:[#allocation1] ss:$2 sm:$0xff] %v2222_v0 }
  0x39   : > { %733 = vst [vmem:[#allocation1 + $0x10] ss:$2 sm:$0xff] %v2224_v1  ;;  %650 = vrot.lane.b32.xlu1 %v642_v16, %s2167_s30  ;;  %648 = vrot.lane.b32.xlu2 %v641_v14, %s2167_s30 }
  0x3f   : > { %v2255_v17 = vld.sshfl [vmem:[#allocation1] sm:$0xff pattern:$0x75316420]  ;;  %v2257_v18 = vld.sshfl [vmem:[#allocation1 + $0x8] sm:$0xff pattern:$0x75316420] }
  0x40   : > { %v2259_v19 = vld.sshfl [vmem:[#allocation1 + $0x10] sm:$0xff pattern:$0x75316420]  ;;  %646 = vrot.lane.b32.xlu0 %v640_v15, %s2167_s30  ;;  %809 = vst [vmem:[#allocation1] ss:$2 sm:$0xff] %v2222_v0 }
  0x41   : > { %811 = vst [vmem:[#allocation1 + $0x10] ss:$2 sm:$0xff] %v2224_v1 }
  0x47   : > { %v813_v20 = vld.sshfl [vmem:[#allocation1 + $0x8] sm:$0xff pattern:$0x75316420]  ;;  %v812_v21 = vld.sshfl [vmem:[#allocation1] sm:$0xff pattern:$0x75316420] }
  0x48   : > { %820 = vrot.lane.b32.xlu1 %v813_v20, %s2168_s7  ;;  %818 = vrot.lane.b32.xlu0 %v812_v21, %s2168_s7  ;;  %903 = vst [vmem:[#allocation1] ss:$2 sm:$0xff] %v2222_v0  ;;  %v814_v22 = vld.sshfl [vmem:[#allocation1 + $0x10] sm:$0xff pattern:$0x75316420]  ;;  %v260_v20 = vld [vmem:[%s2609_s2 + $0x38] sm:$0xff] }
  0x49   : > { %905 = vst [vmem:[#allocation1 + $0x10] ss:$2 sm:$0xff] %v2224_v1  ;;  %822 = vrot.lane.b32.xlu2 %v814_v22, %s2168_s7 }
  0x4f   : > { %v907_v23 = vld.sshfl [vmem:[#allocation1 + $0x8] sm:$0xff pattern:$0x75316420]  ;;  %v906_v24 = vld.sshfl [vmem:[#allocation1] sm:$0xff pattern:$0x75316420] }
  0x50   : > { %914 = vrot.lane.b32.xlu1 %v907_v23, %s2169_s8  ;;  %912 = vrot.lane.b32.xlu0 %v906_v24, %s2169_s8  ;;  %997 = vst [vmem:[#allocation1] ss:$2 sm:$0xff] %v2222_v0  ;;  %v908_v25 = vld.sshfl [vmem:[#allocation1 + $0x10] sm:$0xff pattern:$0x75316420] }
  0x51   : > { %999 = vst [vmem:[#allocation1 + $0x10] ss:$2 sm:$0xff] %v2224_v1  ;;  %916 = vrot.lane.b32.xlu2 %v908_v25, %s2169_s8 }
  0x57   : > { %v1001_v26 = vld.sshfl [vmem:[#allocation1 + $0x8] sm:$0xff pattern:$0x75316420]  ;;  %v1000_v27 = vld.sshfl [vmem:[#allocation1] sm:$0xff pattern:$0x75316420] }
  0x58   : > { %1008 = vrot.lane.b32.xlu1 %v1001_v26, %s2170_s9  ;;  %1006 = vrot.lane.b32.xlu0 %v1000_v27, %s2170_s9  ;;  %1091 = vst [vmem:[#allocation1] ss:$2 sm:$0xff] %v2222_v0  ;;  %v1002_v28 = vld.sshfl [vmem:[#allocation1 + $0x10] sm:$0xff pattern:$0x75316420]  ;;  %v261_v27 = vld [vmem:[%s2609_s2 + $0x40] sm:$0xff] }
  0x59   : > { %1093 = vst [vmem:[#allocation1 + $0x10] ss:$2 sm:$0xff] %v2224_v1  ;;  %1010 = vrot.lane.b32.xlu2 %v1002_v28, %s2170_s9 }
  0x5f   : > { %v1095_v29 = vld.sshfl [vmem:[#allocation1 + $0x8] sm:$0xff pattern:$0x75316420]  ;;  %v1094_v30 = vld.sshfl [vmem:[#allocation1] sm:$0xff pattern:$0x75316420] }
  0x60   : > { %1102 = vrot.lane.b32.xlu1 %v1095_v29, %s2171_s10  ;;  %1100 = vrot.lane.b32.xlu0 %v1094_v30, %s2171_s10  ;;  %v1096_v31 = vld.sshfl [vmem:[#allocation1 + $0x10] sm:$0xff pattern:$0x75316420] }
  0x61   : > { %1104 = vrot.lane.b32.xlu2 %v1096_v31, %s2171_s10 }
  0x7a   : > { %v371_v33 = vpop.permute.xlu2 %370 }
  0x83   : > { %v373_v36 = vpop.permute.xlu2 %372 }
  0x84   : > { %v377_v40 = vsel %vm376_vm2, %v371_v33, %v373_v36 }
  0x8b   : > { %v557_v45 = vpop.permute.xlu2 %556 }
  0x92   : > { %v369_v37 = vpop.permute.xlu1 %368 }
  0x93   : > { %v379_v39 = vsel %vm376_vm2, %v373_v36, %v369_v37  ;;  %v378_v51 = vsel %vm376_vm2, %v369_v37, %v371_v33  ;;  %v649_v52 = vpop.permute.xlu2 %648 }
  0x94   : > { %2014 = vmatpush.msk.msrb.mxu2 %vm292_vm0, %v379_v39 }
  0x95   : > { %2015 = vmatmul.msk.f32.vlgmr.msrb.gmra.mxu2 %vm288_vm1, %v253_v38 }
  0x96   : > { %v2436_v28 = vpop.f32.mrf.mxu0 }
  0x97   : > { %v2438_v29 = vpop.f32.mrf.mxu1 }
  0x9a   : > { %v392_v41 = vpop.permute.xlu1 %391  ;;  %v390_v42 = vpop.permute.xlu0 %389 }
  0x9b   : > { %v397_v43 = vsel %vm395_vm3, %v390_v42, %v392_v41 }
  0x9c   : > { %2010 = vmatpush.msk.msrb.mxu0 %vm292_vm0, %v397_v43 }
  0x9d   : > { %2011 = vmatmul.msk.f32.vlgmr.msrb.gmra.mxu0 %vm288_vm1, %v254_v44  ;;  %v2440_v31 = vpop.f32.mrf.mxu2 }
  0x9e   : > { %2018 = vmatpush.msk.msra.mxu0 %vm292_vm0, %v377_v40 }
  0xa2   : > { %v394_v46 = vpop.permute.xlu0 %393  ;;  %v555_v47 = vpop.permute.xlu1 %554 }
  0xa3   : > { %v398_v48 = vsel %vm395_vm3, %v394_v46, %v390_v42  ;;  %v396_v49 = vsel %vm395_vm3, %v392_v41, %v394_v46  ;;  %v559_v50 = vsel %vm558_vm4, %v555_v47, %v557_v45  ;;  %v823_v61 = vpop.permute.xlu2 %822 }
  0xa4   : > { %2008 = vmatpush.msk.msra.mxu3 %vm292_vm0, %v398_v48  ;;  %2012 = vmatpush.msk.msrb.mxu1 %vm292_vm0, %v396_v49 }
  0xa5   : > { %2009 = vmatmul.msk.f32.vlgmr.msra.gmra.mxu3 %vm288_vm1, %v254_v44  ;;  %2013 = vmatmul.msk.f32.vlgmr.msrb.gmra.mxu1 %vm288_vm1, %v254_v44 }
  0xa6   : > { %2016 = vmatpush.msk.msrb.mxu3 %vm292_vm0, %v378_v51  ;;  %2019 = vmatmul.msk.f32.vlgmr.msra.gmra.mxu0 %vm288_vm1, %v253_v38 }
  0xa8   : > { %2024 = vmatpush.msk.msra.mxu3 %vm292_vm0, %v559_v50 }
  0xaa   : > { %v553_v53 = vpop.permute.xlu0 %552 }
  0xab   : > { %v560_v55 = vsel %vm558_vm4, %v553_v53, %v555_v47  ;;  %v561_v56 = vsel %vm558_vm4, %v557_v45, %v553_v53  ;;  %v651_v57 = vpop.permute.xlu1 %650  ;;  %v917_v7 = vpop.permute.xlu2 %916 }
  0xac   : > { %2020 = vmatpush.msk.msra.mxu1 %vm292_vm0, %v561_v56  ;;  %2022 = vmatpush.msk.msra.mxu2 %vm292_vm0, %v560_v55  ;;  %v653_v58 = vsel %vm652_vm5, %v649_v52, %v651_v57 }
  0xad   : > { %2017 = vmatmul.msk.f32.vlgmr.msrb.gmra.mxu3 %vm288_vm1, %v253_v38  ;;  %2021 = vmatmul.msk.f32.vlgmr.msra.gmra.mxu1 %vm288_vm1, %v255_v54 }
  0xae   : > { %2023 = vmatmul.msk.f32.vlgmr.msra.gmra.mxu2 %vm288_vm1, %v255_v54  ;;  %2032 = vmatpush.msk.msrb.mxu3 %vm292_vm0, %v2255_v17 }
  0xaf   : > { %2030 = vmatpush.msk.msrb.mxu2 %vm292_vm0, %v653_v58 }
  0xb2   : > { %v647_v59 = vpop.permute.xlu0 %646 }
  0xb3   : > { %v654_v62 = vsel %vm652_vm5, %v647_v59, %v649_v52  ;;  %v655_v63 = vsel %vm652_vm5, %v651_v57, %v647_v59  ;;  %v1011_v14 = vpop.permute.xlu2 %1010 }
  0xb4   : > { %2026 = vmatpush.msk.msrb.mxu0 %vm292_vm0, %v655_v63  ;;  %2028 = vmatpush.msk.msrb.mxu1 %vm292_vm0, %v654_v62 }
  0xb5   : > { %2025 = vmatmul.msk.f32.vlgmr.msra.gmra.mxu3 %vm288_vm1, %v255_v54  ;;  %2027 = vmatmul.msk.f32.vlgmr.msrb.gmra.mxu0 %vm288_vm1, %v256_v60 }
  0xb6   : > { %2029 = vmatmul.msk.f32.vlgmr.msrb.gmra.mxu1 %vm288_vm1, %v256_v60  ;;  %2031 = vmatmul.msk.f32.vlgmr.msrb.gmra.mxu2 %vm288_vm1, %v256_v60 }
  0xb7   : > { %2034 = vmatpush.msk.msra.mxu0 %vm292_vm0, %v2257_v18  ;;  %2036 = vmatpush.msk.msra.mxu1 %vm292_vm0, %v2259_v19 }
  0xba   : > { %v821_v0 = vpop.permute.xlu1 %820  ;;  %v819_v1 = vpop.permute.xlu0 %818 }
  0xbb   : > { %v825_v3 = vsel %vm824_vm6, %v821_v0, %v823_v61  ;;  %v826_v4 = vsel %vm824_vm6, %v819_v1, %v821_v0  ;;  %v827_v5 = vsel %vm824_vm6, %v823_v61, %v819_v1  ;;  %v1105_v21 = vpop.permute.xlu2 %1104 }
  0xbc   : > { %2038 = vmatpush.msk.msra.mxu2 %vm292_vm0, %v826_v4  ;;  %2040 = vmatpush.msk.msra.mxu3 %vm292_vm0, %v825_v3 }
  0xbd   : > { %2042 = vmatpush.msk.msrb.mxu0 %vm292_vm0, %v827_v5  ;;  %2033 = vmatmul.msk.f32.vlgmr.msrb.gmra.mxu3 %vm288_vm1, %v257_v2 }
  0xbe   : > { %2035 = vmatmul.msk.f32.vlgmr.msra.gmra.mxu0 %vm288_vm1, %v257_v2  ;;  %2037 = vmatmul.msk.f32.vlgmr.msra.gmra.mxu1 %vm288_vm1, %v257_v2 }
  0xbf   : > { %2039 = vmatmul.msk.f32.vlgmr.msra.gmra.mxu2 %vm288_vm1, %v258_v6 }
  0xc2   : > { %v915_v8 = vpop.permute.xlu1 %914  ;;  %v913_v9 = vpop.permute.xlu0 %912 }
  0xc3   : > { %v919_v10 = vsel %vm918_vm7, %v915_v8, %v917_v7  ;;  %v920_v11 = vsel %vm918_vm7, %v913_v9, %v915_v8  ;;  %v921_v12 = vsel %vm918_vm7, %v917_v7, %v913_v9  ;;  %v252_v9 = vld [vmem:[%s2608_s1] sm:$0x7] }
  0xc4   : > { %2044 = vmatpush.msk.msrb.mxu1 %vm292_vm0, %v920_v11  ;;  %2046 = vmatpush.msk.msrb.mxu2 %vm292_vm0, %v919_v10 }
  0xc5   : > { %2048 = vmatpush.msk.msrb.mxu3 %vm292_vm0, %v921_v12 }
  0xc6   : > { %2041 = vmatmul.msk.f32.vlgmr.msra.gmra.mxu3 %vm288_vm1, %v258_v6  ;;  %2043 = vmatmul.msk.f32.vlgmr.msrb.gmra.mxu0 %vm288_vm1, %v258_v6 }
  0xc7   : > { %2045 = vmatmul.msk.f32.vlgmr.msrb.gmra.mxu1 %vm288_vm1, %v259_v13  ;;  %2047 = vmatmul.msk.f32.vlgmr.msrb.gmra.mxu2 %vm288_vm1, %v259_v13 }
  0xca   : > { %v1009_v15 = vpop.permute.xlu1 %1008  ;;  %v1007_v16 = vpop.permute.xlu0 %1006 }
  0xcb   : > { %v1013_v17 = vsel %vm1012_vm8, %v1009_v15, %v1011_v14  ;;  %v1014_v18 = vsel %vm1012_vm8, %v1007_v16, %v1009_v15  ;;  %v1015_v19 = vsel %vm1012_vm8, %v1011_v14, %v1007_v16  ;;  %v2445_v16 = vperm.slane %v252_v9, 1 }
  0xcc   : > { %2050 = vmatpush.msk.msra.mxu0 %vm292_vm0, %v1014_v18  ;;  %2052 = vmatpush.msk.msra.mxu1 %vm292_vm0, %v1013_v17 }
  0xcd   : > { %2054 = vmatpush.msk.msra.mxu2 %vm292_vm0, %v1015_v19  ;;  %v2447_v19 = vperm.slane %v252_v9, 0 }
  0xce   : > { %2049 = vmatmul.msk.f32.vlgmr.msrb.gmra.mxu3 %vm288_vm1, %v259_v13  ;;  %2051 = vmatmul.msk.f32.vlgmr.msra.gmra.mxu0 %vm288_vm1, %v260_v20 }
  0xcf   : > { %2053 = vmatmul.msk.f32.vlgmr.msra.gmra.mxu1 %vm288_vm1, %v260_v20  ;;  %2055 = vmatmul.msk.f32.vlgmr.msra.gmra.mxu2 %vm288_vm1, %v260_v20  ;;  %v2449_v20 = vperm.slane %v252_v9, 2 }
  0xd2   : > { %v1103_v22 = vpop.permute.xlu1 %1102  ;;  %v1101_v23 = vpop.permute.xlu0 %1100 }
  0xd3   : > { %v1107_v24 = vsel %vm1106_vm9, %v1103_v22, %v1105_v21  ;;  %v1108_v25 = vsel %vm1106_vm9, %v1101_v23, %v1103_v22  ;;  %v1109_v26 = vsel %vm1106_vm9, %v1105_v21, %v1101_v23 }
  0xd4   : > { %2056 = vmatpush.msk.msra.mxu3 %vm292_vm0, %v1108_v25  ;;  %2058 = vmatpush.msk.msrb.mxu0 %vm292_vm0, %v1107_v24 }
  0xd5   : > { %2060 = vmatpush.msk.msrb.mxu1 %vm292_vm0, %v1109_v26 }
  0xd6   : > { %2057 = vmatmul.msk.f32.vlgmr.msra.gmra.mxu3 %vm288_vm1, %v261_v27  ;;  %2059 = vmatmul.msk.f32.vlgmr.msrb.gmra.mxu0 %vm288_vm1, %v261_v27 }
  0xd7   : > { %2061 = vmatmul.msk.f32.vlgmr.msrb.gmra.mxu1 %vm288_vm1, %v261_v27 }
 0x118   : > { %v500_v36 = vpop.f32.mrf.mxu2 }
 0x11a   : > { %v448_v30 = vpop.f32.mrf.mxu0 }
 0x122   : > { %v468_v32 = vpop.f32.mrf.mxu1 }
 0x123   : > { %v540_v34 = vpop.f32.mrf.mxu0 }
 0x124   : > { %v541_v50 = vadd.f32 %v540_v34, %v468_v32 }
 0x128   : > { %v428_v33 = vpop.f32.mrf.mxu3 }
 0x129   : > { %v501_v53 = vadd.f32 %v500_v36, %v428_v33 }
 0x12a   : > { %v591_v37 = vpop.f32.mrf.mxu1 }
 0x12b   : > { %v634_v57 = vadd.f32 %v591_v37, %v501_v53 }
 0x130   : > { %v520_v38 = vpop.f32.mrf.mxu3 }
 0x131   : > { %v611_v39 = vpop.f32.mrf.mxu2  ;;  %v521_v46 = vadd.f32 %v520_v38, %v448_v30 }
 0x132   : > { %v685_v40 = vpop.f32.mrf.mxu0 }
 0x133   : > { %v705_v41 = vpop.f32.mrf.mxu1  ;;  %v635_v51 = vadd.f32 %v611_v39, %v521_v46  ;;  %v728_v62 = vadd.f32 %v685_v40, %v634_v57 }
 0x135   : > { %v729_v55 = vadd.f32 %v705_v41, %v635_v51 }
 0x138   : > { %v631_v42 = vpop.f32.mrf.mxu3 }
 0x139   : > { %v725_v43 = vpop.f32.mrf.mxu2  ;;  %v636_v54 = vadd.f32 %v631_v42, %v541_v50 }
 0x13b   : > { %v783_v44 = vpop.f32.mrf.mxu0  ;;  %v803_v45 = vpop.f32.mrf.mxu1  ;;  %v730_v58 = vadd.f32 %v725_v43, %v636_v54 }
 0x13c   : > { %v807_v59 = vadd.f32 %v783_v44, %v729_v55 }
 0x13d   : > { %v808_v1 = vadd.f32 %v803_v45, %v730_v58 }
 0x140   : > { %v763_v47 = vpop.f32.mrf.mxu3 }
 0x141   : > { %v806_v2 = vadd.f32 %v763_v47, %v728_v62 }
 0x142   : > { %v857_v48 = vpop.f32.mrf.mxu2 }
 0x143   : > { %v897_v49 = vpop.f32.mrf.mxu0  ;;  %v900_v6 = vadd.f32 %v857_v48, %v806_v2 }
 0x144   : > { %v951_v52 = vpop.f32.mrf.mxu1  ;;  %v902_v3 = vadd.f32 %v897_v49, %v808_v1  ;;  %v2172_v49 = vmov 0  }
 0x145   : > { %v994_v14 = vadd.f32 %v951_v52, %v900_v6  ;;  %2150 = vset.pattern.permute.xlu1 %v2172_v49  ;;  %2151 = vset.pattern.permute.xlu0 %v2172_v49 }
 0x149   : > { %v877_v56 = vpop.f32.mrf.mxu3 }
 0x14a   : > { %v971_v60 = vpop.f32.mrf.mxu2  ;;  %v901_v63 = vadd.f32 %v877_v56, %v807_v59 }
 0x14b   : > { %v1045_v61 = vpop.f32.mrf.mxu0 }
 0x14c   : > { %v1065_v0 = vpop.f32.mrf.mxu1  ;;  %v995_v4 = vadd.f32 %v971_v60, %v901_v63  ;;  %v1088_v17 = vadd.f32 %v1045_v61, %v994_v14 }
 0x14e   : > { %v1089_v11 = vadd.f32 %v1065_v0, %v995_v4 }
 0x151   : > { %v991_v5 = vpop.f32.mrf.mxu3 }
 0x152   : > { %v996_v7 = vadd.f32 %v991_v5, %v902_v3  ;;  %v1085_v8 = vpop.f32.mrf.mxu2  ;;  %v272_v3 = vld [vmem:[%s2612_s5] sm:$0xff] }
 0x153   : > { %v1159_v10 = vpop.f32.mrf.mxu0 }
 0x154   : > { %v1090_v12 = vadd.f32 %v1085_v8, %v996_v7  ;;  %v1179_v13 = vpop.f32.mrf.mxu1  ;;  %v1183_v15 = vadd.f32 %v1159_v10, %v1089_v11  ;;  %v263_v7 = vld [vmem:[%s2610_s3 + $0x8] sm:$0xff] }
 0x156   : > { %v1184_v18 = vadd.f32 %v1179_v13, %v1090_v12  ;;  %v1193_v22 = vmul.f32 %v2445_v16, %v1183_v15 }
 0x158   : > { %v1194_v25 = vmul.f32 %v2449_v20, %v1184_v18  ;;  %v1201_v26 = vmul.f32 %v1193_v22, %v1183_v15 }
 0x159   : > { %v1139_v21 = vpop.f32.mrf.mxu3 }
 0x15a   : > { %v1182_v23 = vadd.f32 %v1139_v21, %v1088_v17  ;;  %v1202_v33 = vmul.f32 %v1194_v25, %v1184_v18 }
 0x15c   : > { %v1192_v24 = vmul.f32 %v2447_v19, %v1182_v23 }
 0x15e   : > { %v1200_v27 = vmul.f32 %v1192_v24, %v1182_v23  ;;  %v1195_v30 = vadd.f32 %v1193_v22, %v1192_v24 }
 0x160   : > { %v1196_v32 = vadd.f32 %v1195_v30, %v1194_v25  ;;  %v1203_v34 = vadd.f32 %v1201_v26, %v1200_v27  ;;  %v265_v30 = vld [vmem:[%s2610_s3 + $0x18] sm:$0xff] }
 0x162   : > { %1197 = vadd.xlane.f32.xlu0 %v1196_v32  ;;  %v1204_v36 = vadd.f32 %v1203_v34, %v1202_v33 }
 0x164   : > { %1205 = vadd.xlane.f32.xlu1 %v1204_v36 }
 0x1d5   : > { %v1198_v37 = vpop.xlane.xlu0 %1197 }
 0x1d6   : > { %v1199_v38 = vmul.f32 0.00390625, %v1198_v37  ;;  %v264_v37 = vld [vmem:[%s2610_s3 + $0x10] sm:$0xff] }
 0x1d7   : > { %v1206_v39 = vpop.xlane.xlu1 %1205 }
 0x1d8   : > { %v1207_v40 = vmul.f32 0.00390625, %v1206_v39  ;;  %v1208_v41 = vmul.f32 %v1199_v38, %v1199_v38  ;;  %v1211_v52 = vsub.f32 %v1182_v23, %v1199_v38  ;;  %v1212_v53 = vsub.f32 %v1183_v15, %v1199_v38  ;;  %v262_v15 = vld [vmem:[%s2610_s3] sm:$0xff] }
 0x1d9   : > { %v1213_v54 = vsub.f32 %v1184_v18, %v1199_v38 }
 0x1da   : > { %v1209_v42 = vsub.f32 %v1207_v40, %v1208_v41 }
 0x1dc   : > { %v1210_v43 = vmax.f32 %v1209_v42, 0.0  ;;  %v266_v42 = vld [vmem:[%s2610_s3 + $0x20] sm:$0xff] }
 0x1de   : > { %v1214_v44 = vadd.f32 1e-05, %v1210_v43 }
 0x1e0   : > { %2152 = vrsqrt.f32 %v1214_v44  ;;  %vm1221_vm11 = vweird.f32 %v1214_v44 }
 0x1e6   : > { %v2153_v45 = vpop.eup %2152 }
 0x1e7   : > { %v1216_v46 = vmul.f32 %v2153_v45, %v1214_v44  ;;  %vm1222_vm10 = vweird.f32 %v2153_v45 }
 0x1e8   : > { %vm1223_vm12 = vmor %vm1221_vm11, %vm1222_vm10 }
 0x1e9   : > { %v1217_v47 = vmul.f32 %v2153_v45, %v1216_v46 }
 0x1eb   : > { %v1218_v48 = vmul.f32 0.5, %v1217_v47 }
 0x1ed   : > { %v1219_v50 = vsub.f32 1.5, %v1218_v48 }
 0x1ef   : > { %v1220_v51 = vmul.f32 %v2153_v45, %v1219_v50 }
 0x1f1   : > { %v1224_v55 = vsel %vm1223_vm12, %v2153_v45, %v1220_v51 }
 0x1f2   : > { %v1225_v56 = vmul.f32 %v1224_v55, %v1211_v52  ;;  %v1226_v57 = vmul.f32 %v1224_v55, %v1212_v53  ;;  %v1227_v58 = vmul.f32 %v1224_v55, %v1213_v54  ;;  %v267_v52 = vld [vmem:[%s2610_s3 + $0x28] sm:$0xff] }
 0x1f4   : > { %v1228_v59 = vmax.f32 %v1225_v56, 0.0  ;;  %v1229_v60 = vmax.f32 %v1226_v57, 0.0  ;;  %v1230_v61 = vmax.f32 %v1227_v58, 0.0 }
 0x1f6   : > { %v2455_v62 = vmul.f32 %v1228_v59, %v2447_v19  ;;  %v1232_v63 = vmul.f32 %v1229_v60, %v2445_v16  ;;  %v2459_v0 = vmul.f32 %v1230_v61, %v2449_v20 }
 0x1f8   : > { %1456 = vrot.lane.b32.xlu1 %v1232_v63, %s2167_s30  ;;  %v2125_v1 = vpack.i.bf16 %v2459_v0, %v2455_v62  ;;  %v2110_v2 = vpack.i.bf16 %v1232_v63, %v2455_v62 }
 0x1fa   : > { %2126 = vrot.lane.b32.xlu0 %v2125_v1, %s2167_s30  ;;  %2111 = vrot.lane.b32.xlu2 %v2110_v2, %s2165_s28 }
 0x200   : > { %2141 = vrot.lane.b32.xlu1 %v2110_v2, %s2170_s9 }
 0x202   : > { %2136 = vrot.lane.b32.xlu0 %v2110_v2, %s2169_s8  ;;  %1247 = vrot.lane.b32.xlu2 %v2459_v0, %s2165_s28 }
 0x208   : > { %1824 = vrot.lane.b32.xlu1 %v2459_v0, %s2171_s10 }
 0x20a   : > { %1749 = vrot.lane.b32.xlu0 %v2459_v0, %s2170_s9  ;;  %2116 = vrot.lane.b32.xlu2 %v2110_v2, %s2164_s27 }
 0x210   : > { %277 = vperm.xlu1 %2150, %v272_v3  }
 0x212   : > { %1238 = vrot.lane.b32.xlu2 %v2459_v0, %s2164_s27 }
 0x21a   : > { %2121 = vrot.lane.b32.xlu2 %v2110_v2, %s2166_s29 }
 0x222   : > { %1383 = vrot.lane.b32.xlu2 %v2459_v0, %s2166_s29 }
 0x22a   : > { %2131 = vrot.lane.b32.xlu2 %v2110_v2, %s2168_s7 }
 0x232   : > { %1599 = vrot.lane.b32.xlu2 %v2459_v0, %s2168_s7 }
 0x23a   : > { %1674 = vrot.lane.b32.xlu2 %v2459_v0, %s2169_s8 }
 0x242   : > { %2146 = vrot.lane.b32.xlu2 %v2110_v2, %s2171_s10  ;;  %v269_v2 = vld [vmem:[%s2610_s3 + $0x38] sm:$0xff] }
 0x254   : > { %v2112_v4 = vpop.permute.xlu2 %2111 }
 0x255   : > { %v2114_v5 = vunpack.i.h.bf16 %v2112_v4  ;;  %v2113_v6 = vunpack.i.l.bf16 %v2112_v4 }
 0x257   : > { %v1250_v8 = vsel %vm395_vm3, %v2113_v6, %v2114_v5 }
 0x258   : > { %1291 = vmatpush.msrb.mxu3 %v1250_v8  ;;  %v270_v8 = vld [vmem:[%s2610_s3 + $0x40] sm:$0xff] }
 0x259   : > { %2063 = vmatmul.msk.f32.vlgmr.msrb.gmra.mxu3 %vm1252_vm13, %v263_v7 }
 0x25c   : > { %v1248_v9 = vpop.permute.xlu2 %1247 }
 0x25d   : > { %v1249_v10 = vsel %vm395_vm3, %v2114_v5, %v1248_v9  ;;  %v1251_v11 = vsel %vm395_vm3, %v1248_v9, %v2113_v6 }
 0x25e   : > { %1271 = vmatpush.msrb.mxu2 %v1251_v11  ;;  %1311 = vmatpush.msra.mxu0 %v1249_v10 }
 0x25f   : > { %2062 = vmatmul.msk.f32.vlgmr.msrb.gmra.mxu2 %vm1252_vm13, %v263_v7  ;;  %2064 = vmatmul.msk.f32.vlgmr.msra.gmra.mxu0 %vm1252_vm13, %v263_v7 }
 0x264   : > { %v2117_v12 = vpop.permute.xlu2 %2116 }
 0x265   : > { %v2119_v13 = vunpack.i.h.bf16 %v2117_v12  ;;  %v2118_v14 = vunpack.i.l.bf16 %v2117_v12 }
 0x267   : > { %v1241_v17 = vsel %vm376_vm2, %v2118_v14, %v2119_v13 }
 0x268   : > { %1354 = vmatpush.msra.mxu2 %v1241_v17 }
 0x269   : > { %2066 = vmatmul.msk.f32.vlgmr.msra.gmra.mxu2 %vm1252_vm13, %v262_v15 }
 0x26a   : > { %v1457_v34 = vpop.permute.xlu1 %1456 }
 0x26c   : > { %v2127_v18 = vpop.permute.xlu0 %2126  ;;  %v1239_v21 = vpop.permute.xlu2 %1238 }
 0x26d   : > { %v2129_v22 = vunpack.i.h.bf16 %v2127_v18  ;;  %v2128_v23 = vunpack.i.l.bf16 %v2127_v18  ;;  %v1240_v24 = vsel %vm376_vm2, %v2119_v13, %v1239_v21  ;;  %v1242_v25 = vsel %vm376_vm2, %v1239_v21, %v2118_v14 }
 0x26e   : > { %1334 = vmatpush.msra.mxu1 %v1242_v25  ;;  %1374 = vmatpush.msra.mxu3 %v1240_v24 }
 0x26f   : > { %v1462_v26 = vsel %vm652_vm5, %v2129_v22, %v2128_v23  ;;  %2067 = vmatmul.msk.f32.vlgmr.msra.gmra.mxu3 %vm1252_vm13, %v262_v15  ;;  %2065 = vmatmul.msk.f32.vlgmr.msra.gmra.mxu1 %vm1252_vm13, %v262_v15  ;;  %v1460_v38 = vsel %vm652_vm5, %v1457_v34, %v2129_v22  ;;  %v1461_v43 = vsel %vm652_vm5, %v2128_v23, %v1457_v34 }
 0x270   : > { %1481 = vmatpush.msrb.mxu3 %v1462_v26 }
 0x272   : > { %1567 = vmatpush.msra.mxu3 %v1232_v63  ;;  %v2142_v53 = vpop.permute.xlu1 %2141  ;;  %v268_v63 = vld [vmem:[%s2610_s3 + $0x30] sm:$0xff] }
 0x273   : > { %v2144_v54 = vunpack.i.h.bf16 %v2142_v53  ;;  %v2143_v55 = vunpack.i.l.bf16 %v2142_v53 }
 0x274   : > { %v2122_v27 = vpop.permute.xlu2 %2121  ;;  %v2137_v44 = vpop.permute.xlu0 %2136 }
 0x275   : > { %v2124_v32 = vunpack.i.h.bf16 %v2122_v27  ;;  %v2123_v33 = vunpack.i.l.bf16 %v2122_v27  ;;  %v2139_v45 = vunpack.i.h.bf16 %v2137_v44  ;;  %v2138_v46 = vunpack.i.l.bf16 %v2137_v44 }
 0x276   : > { %v1752_v61 = vsel %vm1012_vm8, %v2143_v55, %v2144_v54 }
 0x277   : > { %v1386_v36 = vsel %vm558_vm4, %v2123_v33, %v2124_v32  ;;  %2071 = vmatmul.msk.f32.vlgmr.msrb.gmra.mxu3 %vm1252_vm13, %v265_v30  ;;  %v1677_v50 = vsel %vm918_vm7, %v2138_v46, %v2139_v45 }
 0x278   : > { %1426 = vmatpush.msrb.mxu1 %v1386_v36 }
 0x279   : > { %2069 = vmatmul.msk.f32.vlgmr.msrb.gmra.mxu1 %vm1252_vm13, %v264_v37 }
 0x27a   : > { %1521 = vmatpush.msra.mxu1 %v1460_v38  ;;  %v1825_v7 = vpop.permute.xlu1 %1824 }
 0x27c   : > { %v1384_v39 = vpop.permute.xlu2 %1383  ;;  %v1750_v56 = vpop.permute.xlu0 %1749 }
 0x27d   : > { %v1385_v40 = vsel %vm558_vm4, %v2124_v32, %v1384_v39  ;;  %v1387_v41 = vsel %vm558_vm4, %v1384_v39, %v2123_v33  ;;  %v1751_v60 = vsel %vm1012_vm8, %v2144_v54, %v1750_v56  ;;  %v1753_v3 = vsel %vm1012_vm8, %v1750_v56, %v2143_v55 }
 0x27e   : > { %1406 = vmatpush.msrb.mxu0 %v1387_v41  ;;  %1446 = vmatpush.msrb.mxu2 %v1385_v40 }
 0x27f   : > { %2068 = vmatmul.msk.f32.vlgmr.msrb.gmra.mxu0 %vm1252_vm13, %v264_v37  ;;  %2070 = vmatmul.msk.f32.vlgmr.msrb.gmra.mxu2 %vm1252_vm13, %v264_v37 }
 0x280   : > { %1501 = vmatpush.msra.mxu0 %v1461_v43  ;;  %1547 = vmatpush.msra.mxu2 %v2455_v62 }
 0x281   : > { %2075 = vmatmul.msk.f32.vlgmr.msra.gmra.mxu3 %vm1252_vm13, %v266_v42  ;;  %2073 = vmatmul.msk.f32.vlgmr.msra.gmra.mxu1 %vm1252_vm13, %v265_v30 }
 0x282   : > { %1587 = vmatpush.msrb.mxu0 %v2459_v0 }
 0x284   : > { %v2132_v47 = vpop.permute.xlu2 %2131 }
 0x285   : > { %v2134_v48 = vunpack.i.h.bf16 %v2132_v47  ;;  %v2133_v49 = vunpack.i.l.bf16 %v2132_v47 }
 0x287   : > { %2072 = vmatmul.msk.f32.vlgmr.msra.gmra.mxu0 %vm1252_vm13, %v265_v30  ;;  %2074 = vmatmul.msk.f32.vlgmr.msra.gmra.mxu2 %vm1252_vm13, %v266_v42  ;;  %v1602_v51 = vsel %vm824_vm6, %v2133_v49, %v2134_v48 }
 0x288   : > { %1697 = vmatpush.msra.mxu0 %v1677_v50  ;;  %1622 = vmatpush.msrb.mxu1 %v1602_v51 }
 0x289   : > { %2077 = vmatmul.msk.f32.vlgmr.msrb.gmra.mxu1 %vm1252_vm13, %v267_v52 }
 0x28c   : > { %v1600_v57 = vpop.permute.xlu2 %1599 }
 0x28d   : > { %v1601_v58 = vsel %vm824_vm6, %v2134_v48, %v1600_v57  ;;  %v1603_v59 = vsel %vm824_vm6, %v1600_v57, %v2133_v49 }
 0x28e   : > { %1642 = vmatpush.msrb.mxu2 %v1601_v58  ;;  %1662 = vmatpush.msrb.mxu3 %v1603_v59 }
 0x28f   : > { %2076 = vmatmul.msk.f32.vlgmr.msrb.gmra.mxu0 %vm1252_vm13, %v266_v42  ;;  %2078 = vmatmul.msk.f32.vlgmr.msrb.gmra.mxu2 %vm1252_vm13, %v267_v52 }
 0x290   : > { %2079 = vmatmul.msk.f32.vlgmr.msrb.gmra.mxu3 %vm1252_vm13, %v267_v52  ;;  %1792 = vmatpush.msrb.mxu0 %v1751_v60 }
 0x291   : > { %1772 = vmatpush.msra.mxu3 %v1752_v61 }
 0x294   : > { %v1675_v62 = vpop.permute.xlu2 %1674 }
 0x295   : > { %v1676_v0 = vsel %vm918_vm7, %v2139_v45, %v1675_v62  ;;  %v1678_v1 = vsel %vm918_vm7, %v1675_v62, %v2138_v46 }
 0x296   : > { %1717 = vmatpush.msra.mxu1 %v1676_v0  ;;  %1737 = vmatpush.msra.mxu2 %v1678_v1 }
 0x297   : > { %2080 = vmatmul.msk.f32.vlgmr.msra.gmra.mxu0 %vm1252_vm13, %v268_v63  ;;  %2081 = vmatmul.msk.f32.vlgmr.msra.gmra.mxu1 %vm1252_vm13, %v268_v63 }
 0x298   : > { %2082 = vmatmul.msk.f32.vlgmr.msra.gmra.mxu2 %vm1252_vm13, %v268_v63  ;;  %2083 = vmatmul.msk.f32.vlgmr.msra.gmra.mxu3 %vm1252_vm13, %v269_v2 }
 0x299   : > { %1812 = vmatpush.msrb.mxu1 %v1753_v3 }
 0x29c   : > { %v2147_v4 = vpop.permute.xlu2 %2146 }
 0x29d   : > { %v2149_v5 = vunpack.i.h.bf16 %v2147_v4  ;;  %v2148_v6 = vunpack.i.l.bf16 %v2147_v4 }
 0x29f   : > { %2084 = vmatmul.msk.f32.vlgmr.msrb.gmra.mxu0 %vm1252_vm13, %v269_v2  ;;  %2085 = vmatmul.msk.f32.vlgmr.msrb.gmra.mxu1 %vm1252_vm13, %v269_v2  ;;  %v1827_v9 = vsel %vm1106_vm9, %v2148_v6, %v2149_v5  ;;  %v1826_v10 = vsel %vm1106_vm9, %v2149_v5, %v1825_v7  ;;  %v1828_v11 = vsel %vm1106_vm9, %v1825_v7, %v2148_v6 }
 0x2a0   : > { %1847 = vmatpush.msrb.mxu2 %v1827_v9  ;;  %1867 = vmatpush.msrb.mxu3 %v1826_v10 }
 0x2a1   : > { %1887 = vmatpush.msra.mxu0 %v1828_v11  ;;  %2086 = vmatmul.msk.f32.vlgmr.msrb.gmra.mxu2 %vm1252_vm13, %v270_v8 }
 0x2a2   : > { %2087 = vmatmul.msk.f32.vlgmr.msrb.gmra.mxu3 %vm1252_vm13, %v270_v8 }
 0x2a7   : > { %2088 = vmatmul.msk.f32.vlgmr.msra.gmra.mxu0 %vm1252_vm13, %v270_v8 }
 0x2dc   : > { %v1293_v12 = vpop.f32.mrf.mxu3  ;;  %v1313_v15 = vpop.f32.mrf.mxu0 }
 0x2e2   : > { %v1273_v13 = vpop.f32.mrf.mxu2 }
 0x2ec   : > { %v1336_v14 = vpop.f32.mrf.mxu1  ;;  %v1356_v18 = vpop.f32.mrf.mxu2 }
 0x2ed   : > { %v1357_v33 = vadd.f32 %v1356_v18, %v1293_v12  ;;  %v1337_v36 = vadd.f32 %v1336_v14, %v1273_v13 }
 0x2f2   : > { %v1376_v17 = vpop.f32.mrf.mxu3 }
 0x2f3   : > { %v1377_v37 = vadd.f32 %v1376_v17, %v1313_v15 }
 0x2f6   : > { %v1428_v21 = vpop.f32.mrf.mxu1 }
 0x2f7   : > { %v1452_v42 = vadd.f32 %v1428_v21, %v1357_v33 }
 0x2fa   : > { %v1483_v23 = vpop.f32.mrf.mxu3 }
 0x2fc   : > { %v1408_v22 = vpop.f32.mrf.mxu0 }
 0x2fd   : > { %v1451_v40 = vadd.f32 %v1408_v22, %v1337_v36 }
 0x2fe   : > { %v1523_v24 = vpop.f32.mrf.mxu1 }
 0x2ff   : > { %v1526_v45 = vadd.f32 %v1483_v23, %v1451_v40 }
 0x302   : > { %v1448_v35 = vpop.f32.mrf.mxu2 }
 0x303   : > { %v1453_v41 = vadd.f32 %v1448_v35, %v1377_v37 }
 0x304   : > { %v1503_v25 = vpop.f32.mrf.mxu0  ;;  %v1569_v27 = vpop.f32.mrf.mxu3 }
 0x305   : > { %v1527_v44 = vadd.f32 %v1503_v25, %v1452_v42  ;;  %v1528_v46 = vadd.f32 %v1523_v24, %v1453_v41 }
 0x306   : > { %v1624_v32 = vpop.f32.mrf.mxu1 }
 0x307   : > { %v1593_v49 = vadd.f32 %v1569_v27, %v1527_v44  ;;  %v278_v27 = vpop.permute.xlu1 %277 }
 0x308   : > { %v317_v36 = vadd.f32 %v2436_v28, %v278_v27  ;;  %v337_v37 = vadd.f32 %v2438_v29, %v278_v27 }
 0x30a   : > { %v1549_v26 = vpop.f32.mrf.mxu2 }
 0x30b   : > { %v1592_v47 = vadd.f32 %v1549_v26, %v1526_v45 }
 0x30c   : > { %v1589_v30 = vpop.f32.mrf.mxu0 }
 0x30d   : > { %v1594_v48 = vadd.f32 %v1589_v30, %v1528_v46  ;;  %v1667_v55 = vadd.f32 %v1624_v32, %v1592_v47 }
 0x312   : > { %v1644_v34 = vpop.f32.mrf.mxu2 }
 0x313   : > { %v1664_v38 = vpop.f32.mrf.mxu3  ;;  %v1668_v54 = vadd.f32 %v1644_v34, %v1593_v49 }
 0x314   : > { %v1699_v39 = vpop.f32.mrf.mxu0  ;;  %v1719_v43 = vpop.f32.mrf.mxu1  ;;  %v1669_v52 = vadd.f32 %v1664_v38, %v1594_v48 }
 0x315   : > { %v1742_v58 = vadd.f32 %v1699_v39, %v1667_v55  ;;  %v1743_v59 = vadd.f32 %v1719_v43, %v1668_v54  ;;  %v357_v39 = vadd.f32 %v2440_v31, %v278_v27 }
 0x31b   : > { %v1739_v50 = vpop.f32.mrf.mxu2  ;;  %v1774_v53 = vpop.f32.mrf.mxu3 }
 0x31c   : > { %v1794_v51 = vpop.f32.mrf.mxu0  ;;  %v1744_v56 = vadd.f32 %v1739_v50, %v1669_v52  ;;  %v1814_v57 = vpop.f32.mrf.mxu1  ;;  %v1817_v60 = vadd.f32 %v1774_v53, %v1742_v58 }
 0x31d   : > { %v1818_v62 = vadd.f32 %v1794_v51, %v1743_v59 }
 0x31e   : > { %v1819_v61 = vadd.f32 %v1814_v57, %v1744_v56 }
 0x324   : > { %v1849_v63 = vpop.f32.mrf.mxu2  ;;  %v1889_v0 = vpop.f32.mrf.mxu0 }
 0x325   : > { %v1892_v1 = vadd.f32 %v1849_v63, %v1817_v60  ;;  %v1869_v2 = vpop.f32.mrf.mxu3  ;;  %v1894_v3 = vadd.f32 %v1889_v0, %v1819_v61 }
 0x326   : > { %v1893_v4 = vadd.f32 %v1869_v2, %v1818_v62 }
 0x327   : > { %v1895_v5 = vmul.f32 %v1892_v1, %v2447_v19  ;;  %v1897_v7 = vmul.f32 %v1894_v3, %v2449_v20 }
 0x328   : > { %v1896_v6 = vmul.f32 %v1893_v4, %v2445_v16 }
 0x329   : > { %v1903_v8 = vmul.f32 %v1895_v5, %v1892_v1  ;;  %v1905_v12 = vmul.f32 %v1897_v7, %v1894_v3 }
 0x32a   : > { %v1904_v9 = vmul.f32 %v1896_v6, %v1893_v4  ;;  %v1898_v10 = vadd.f32 %v1896_v6, %v1895_v5 }
 0x32c   : > { %v1899_v11 = vadd.f32 %v1898_v10, %v1897_v7  ;;  %v1906_v13 = vadd.f32 %v1904_v9, %v1903_v8 }
 0x32e   : > { %1900 = vadd.xlane.f32.xlu0 %v1899_v11  ;;  %v1907_v14 = vadd.f32 %v1906_v13, %v1905_v12 }
 0x330   : > { %1908 = vadd.xlane.f32.xlu2 %v1907_v14 }
 0x3a1   : > { %v1901_v15 = vpop.xlane.xlu0 %1900 }
 0x3a2   : > { %v1902_v17 = vmul.f32 0.00390625, %v1901_v15 }
 0x3a3   : > { %v1909_v18 = vpop.xlane.xlu2 %1908 }
 0x3a4   : > { %v1910_v21 = vmul.f32 0.00390625, %v1909_v18  ;;  %v1911_v22 = vmul.f32 %v1902_v17, %v1902_v17  ;;  %v1914_v32 = vsub.f32 %v1892_v1, %v1902_v17  ;;  %v1915_v33 = vsub.f32 %v1893_v4, %v1902_v17 }
 0x3a5   : > { %v1916_v34 = vsub.f32 %v1894_v3, %v1902_v17 }
 0x3a6   : > { %v1912_v23 = vsub.f32 %v1910_v21, %v1911_v22 }
 0x3a8   : > { %v1913_v19 = vmax.f32 %v1912_v23, 0.0 }
 0x3aa   : > { %v1917_v35 = vadd.f32 1e-05, %v1913_v19 }
 0x3ac   : > { %2154 = vrsqrt.f32 %v1917_v35  ;;  %vm1924_vm15 = vweird.f32 %v1917_v35 }
 0x3b2   : > { %v2155_v16 = vpop.eup %2154 }
 0x3b3   : > { %v1919_v20 = vmul.f32 %v2155_v16, %v1917_v35  ;;  %vm1925_vm14 = vweird.f32 %v2155_v16 }
 0x3b4   : > { %vm1926_vm0 = vmor %vm1924_vm15, %vm1925_vm14 }
 0x3b5   : > { %v1920_v24 = vmul.f32 %v2155_v16, %v1919_v20 }
 0x3b7   : > { %v1921_v25 = vmul.f32 0.5, %v1920_v24 }
 0x3b9   : > { %v1922_v26 = vsub.f32 1.5, %v1921_v25 }
 0x3bb   : > { %v1923_v30 = vmul.f32 %v2155_v16, %v1922_v26 }
 0x3bd   : > { %v1927_v38 = vsel %vm1926_vm0, %v2155_v16, %v1923_v30 }
 0x3be   : > { %v1928_v40 = vmul.f32 %v1927_v38, %v1914_v32  ;;  %v1929_v41 = vmul.f32 %v1927_v38, %v1915_v33  ;;  %v1930_v42 = vmul.f32 %v1927_v38, %v1916_v34 }
 0x3c0   : > { %v1931_v43 = vadd.f32 %v1928_v40, %v317_v36  ;;  %v1932_v44 = vadd.f32 %v1929_v41, %v337_v37  ;;  %v1933_v45 = vadd.f32 %v1930_v42, %v357_v39 }
 0x3c2   : > { %v1934_v46 = vmax.f32 %v1931_v43, 0.0  ;;  %v1935_v47 = vmax.f32 %v1932_v44, 0.0  ;;  %v1936_v48 = vmax.f32 %v1933_v45, 0.0 }
 0x3c4   : > { %1937 = vst [vmem:[%s251_s20] sm:$0xff] %v1934_v46 }
 0x3c5   : > { %1938 = vst [vmem:[%s251_s20 + $0x8] sm:$0xff] %v1935_v47 }
 0x3c6   : > { %1939 = vst [vmem:[%s251_s20 + $0x10] sm:$0xff] %v1936_v48 }
 0x3c7 PF: > { %s16_s21 = sadd.s32 1, %s2162_s21  }
 0x3c8   : > { %p13_p4 = scmp.ge.s32.totalorder %s16_s21, 4  }
 0x3ca   :  { %15 = sbr.rel (!%p13_p4) target bundleno = 1 (0x1), region = 84 }

</bundles_post_ra>
